<compile_context>
chip_gen: v7x
topology: tpu7x:2x2x1
jax: 0.10.0
libtpu: 0.0.40
codegen_flags: <defaults>
</compile_context>

<pallas_src>
import functools

import jax
import jax.numpy as jnp
from jax.experimental import pallas as pl
from jax.experimental.pallas import tpu as pltpu


def _identity_map_kernel(z_hbm_ref, fz_hbm_ref, logdet_ref):
    # f_z shares z's donated HBM buffer (input_output_aliases), so the
    # identity transform needs no data movement at all: leave the aliased
    # refs untouched.
    del z_hbm_ref, fz_hbm_ref
    # Log-determinant of the Jacobian of the identity map is exactly 0.
    # (A non-trivial subclass would accumulate per-tile partials here.)
    logdet_ref[0] = jnp.float32(0.0)


def _identity_map_pallas(z):
    batch, dim = z.shape
    f_z, logdet = pl.pallas_call(
        _identity_map_kernel,
        out_shape=(
            jax.ShapeDtypeStruct((batch, dim), z.dtype),
            jax.ShapeDtypeStruct((1,), jnp.float32),
        ),
        in_specs=[pl.BlockSpec(memory_space=pl.ANY)],
        out_specs=(
            pl.BlockSpec(memory_space=pl.ANY),
            pl.BlockSpec(memory_space=pltpu.MemorySpace.SMEM),
        ),
        input_output_aliases={0: 0},
        # Declare the custom call as free so XLA's scheduler can hoist /
        # overlap the surrounding flow-layer ops instead of serializing.
        cost_estimate=pl.CostEstimate(flops=0, transcendentals=0, bytes_accessed=0),
    )(z)
    # Fold the scalar extraction into the traced function (no extra eager
    # slice dispatch or device->host sync at the call site).
    return f_z, logdet[0]


@functools.partial(jax.jit, donate_argnums=0)
def map_forward(z, h):
    """Pallas implementation of Map.forward(z, h) -> (f_z, logdet).

    z's buffer is donated (donate_argnums=0) so f_z aliases it with zero
    bytes of HBM traffic; callers must treat z as consumed and use the
    returned f_z.
    """
    del h  # Unused by the identity map; kept for the Map.forward signature.
    return _identity_map_pallas(z)


def map_forward_direct(z, h):
    """Kernel-free identity path (review's top recommendation): no custom
    call, no launch overhead. Real subclasses would use the Pallas path."""
    del h
    return z, jnp.zeros((), jnp.float32)


if __name__ == "__main__":
    key = jax.random.PRNGKey(0)
    kz, kh = jax.random.split(key)

    # Lane-dense latent dim (multiple of 128) per the review; small batch.
    batch, dim, hidden = 8, 128, 32
    z = jax.random.normal(kz, (batch, dim), dtype=jnp.float32)
    h = jax.random.normal(kh, (batch, hidden), dtype=jnp.float32)

    # Capture a host-side copy of z before the call: z is donated and f_z
    # aliases its buffer, so z must be treated as consumed afterwards.
    z_expected = jax.device_get(z)

    f_z, logdet = map_forward(z, h)
    jax.block_until_ready((f_z, logdet))

    # Sanity check against the reference semantics of the identity map.
    assert f_z.shape == (batch, dim)
    assert jnp.allclose(jax.device_get(f_z), z_expected)
    assert logdet.shape == ()
    assert jnp.allclose(logdet, 0.0)

    # The kernel-free fast path agrees (checked on a fresh, undonated array).
    z2 = jnp.asarray(z_expected)
    f_z2, logdet2 = map_forward_direct(z2, h)
    jax.block_until_ready((f_z2, logdet2))
    assert jnp.allclose(jax.device_get(f_z2), z_expected)
    assert jnp.allclose(logdet2, 0.0)

    print("KERNEL_OK")
</pallas_src>

<mosaic_0001>
module attributes {stable_mosaic.version = 11 : i64} {
  func.func @_identity_map_kernel(%arg0: memref<8x128xf32, #tpu.memory_space<any>>, %arg1: memref<8x128xf32, #tpu.memory_space<any>>, %arg2: memref<1xf32, #tpu.memory_space<smem>>) attributes {dimension_semantics = [], scalar_prefetch = 0 : i64, scratch_operands = 0 : i64, tpu.core_type = #tpu.core_type<tc>} {
    %cst = arith.constant 0.000000e+00 : f32
    %c0 = arith.constant 0 : index
    %0 = memref.load %arg2[%c0] : memref<1xf32, #tpu.memory_space<smem>>
    memref.store %cst, %arg2[%c0] : memref<1xf32, #tpu.memory_space<smem>>
    return
  }
}

</mosaic_0001>

<bundles_post_ra>
// kernel: map_forward.1
= control target key start
LH: loop header
LB: loop body
LE: loop exit
PB: predicated region body
PF: predicated region fallthrough
CT: control target
= control target key end

     0   :  { %8 = vsyncpa [#allocation3], 0  ;;  %s38_s9 = smov 0.0   ;;  %s67_s0 = inlined_call_operand.hbm [shape: f32[8,128], index: 0, kind: input, shape index: {}, may-alias: {0,1}]   ;;  %s68_s1 = inlined_call_operand.hbm [shape: f32[8,128], index: 1, kind: output, shape index: {0}, may-alias: {0,1}]   ;;  %s69_s2 = inlined_call_operand.hbm [shape: f32[1], index: 2, kind: output, shape index: {1}]  }
   0x1   :  { %10 = sst [smem:[#allocation2]] %s38_s9  ;;  %s26_s12 = scalar_lea.hbm %s69_s2, 16 }
   0x2   :  { %p27_p0 = scmp.ne.s32.totalorder %s69_s2, %s26_s12  ;;  %p30_p1 = scmp.lt.u32.totalorder %s26_s12, %s69_s2 }
   0x4   :  { %p32_p2 = pnand %p30_p1, %p27_p0 }
   0x6   :  { %35 = shalt.err (!%p32_p2)
}
   0x7   :  { %s39_s0 = smov [#allocation2]  }
   0x8   :  { %18 = dma.smem_to_hbm %s39_s0, 16, %s69_s2, [#allocation3]  }
   0x9   :  { %36 = dma.done.wait [#allocation3], 16  }
   0xa   :  { %37 = vsyncadd [#allocation3], 4294967280 }
   0xb   :  { %22 = sfence }
   0xc   :  { %23 = vsyncpa [#allocation3], 1 }

</bundles_post_ra>
